<compile_context>
chip_gen: v7x
topology: tpu7x:2x2x1
jax: 0.10.0
libtpu: 0.0.40
codegen_flags: <defaults>
</compile_context>

<pallas_src>
import jax
import jax.numpy as jnp
from jax.experimental import pallas as pl
from jax.experimental.pallas import tpu as pltpu

HIDDEN_SIZE = 32     # params.hidden_size
HIDDEN_SIZE_1 = 32   # params.hidden_size_1


def _round_up(n, m):
    return ((n + m - 1) // m) * m


def mlp_kernel(x_ref, w1_ref, b1_ref, w2_ref, b2_ref, o_ref):
    # x:  (TM, H)  bf16  batch tile
    # w1: (H, H1)  bf16  (nn.Linear weight pre-transposed to (in, out))
    # b1: (1, H1)  f32
    # w2: (1, H1)  f32   second linear weight as a row (VPU path)
    # b2: (1, 1)   f32   SMEM scalar
    # o:  (TM, 1)  f32
    # Dropout before linear1 is identity in eval mode.
    h = jnp.dot(x_ref[...], w1_ref[...], preferred_element_type=jnp.float32)
    h = jnp.tanh(h + b1_ref[...])  # f32 bias add (VPU) + tanh (EUP)
    # Linear 2 (N=1): VPU multiply + XLU lane reduction instead of a 1-column MXU matmul.
    out = jnp.sum(h * w2_ref[...], axis=-1, keepdims=True) + b2_ref[0, 0]
    o_ref[...] = out.astype(o_ref.dtype)


def neural_network_forward(x, w1, b1, w2_row, b2, *, block_rows=512):
    """x: (B, HIDDEN_SIZE) f32 -> logits (B, 1) f32 (eval-mode forward)."""
    B, H = x.shape
    H1 = w1.shape[1]

    # bf16 MXU inputs (f32 accumulation requested inside the kernel).
    x = x.astype(jnp.bfloat16)
    w1 = w1.astype(jnp.bfloat16)

    # Batch tile: multiple of 8 sublanes, capped by block_rows; pad batch to a tile multiple.
    tm = min(_round_up(block_rows, 8), _round_up(B, 8))
    bp = _round_up(B, tm)
    if bp != B:
        x = jnp.pad(x, ((0, bp - B), (0, 0)))

    out = pl.pallas_call(
        mlp_kernel,
        out_shape=jax.ShapeDtypeStruct((bp, 1), jnp.float32),
        grid=(bp // tm,),
        in_specs=[
            pl.BlockSpec((tm, H), lambda i: (i, 0)),             # x: tiled over batch
            pl.BlockSpec((H, H1), lambda i: (0, 0)),             # w1: VMEM-resident
            pl.BlockSpec((1, H1), lambda i: (0, 0)),             # b1: VMEM-resident
            pl.BlockSpec((1, H1), lambda i: (0, 0)),             # w2 row: VMEM-resident
            pl.BlockSpec(memory_space=pltpu.MemorySpace.SMEM),   # b2: SMEM scalar
        ],
        out_specs=pl.BlockSpec((tm, 1), lambda i: (i, 0)),
        compiler_params=pltpu.CompilerParams(
            dimension_semantics=("parallel",)),                  # megacore-shard batch (v7x)
    )(x, w1, b1, w2_row, b2)
    return out[:B]


def init_params(key):
    k1, k2, k3, k4 = jax.random.split(key, 4)
    # Match nn.Linear init scale roughly (uniform +/- 1/sqrt(fan_in)); deterministic via PRNGKey.
    bound1 = 1.0 / jnp.sqrt(HIDDEN_SIZE)
    bound2 = 1.0 / jnp.sqrt(HIDDEN_SIZE_1)
    # First linear stored as (in_features, out_features) — PyTorch weight transposed.
    w1 = jax.random.uniform(k1, (HIDDEN_SIZE, HIDDEN_SIZE_1), jnp.float32, -bound1, bound1)
    b1 = jax.random.uniform(k2, (1, HIDDEN_SIZE_1), jnp.float32, -bound1, bound1)
    # Second linear (out_features=1) stored as a (1, H1) row for the VPU dot-reduce.
    w2_row = jax.random.uniform(k3, (1, HIDDEN_SIZE_1), jnp.float32, -bound2, bound2)
    b2 = jax.random.uniform(k4, (1, 1), jnp.float32, -bound2, bound2)
    return w1, b1, w2_row, b2


if __name__ == "__main__":
    key = jax.random.PRNGKey(0)
    kx, kp = jax.random.split(key)

    BATCH = 250  # exercises batch tiling (tm=128 -> grid=(2,)) and the pad/slice path
    x = jax.random.normal(kx, (BATCH, HIDDEN_SIZE), jnp.float32)
    w1, b1, w2_row, b2 = init_params(kp)

    logits = neural_network_forward(x, w1, b1, w2_row, b2, block_rows=128)
    jax.block_until_ready(logits)

    # Reference in plain JAX with the same bf16 matmul inputs / f32 accumulation.
    xb = x.astype(jnp.bfloat16)
    w1b = w1.astype(jnp.bfloat16)
    h_ref = jnp.tanh(jnp.dot(xb, w1b, preferred_element_type=jnp.float32) + b1)
    ref = jnp.sum(h_ref * w2_row, axis=-1, keepdims=True) + b2[0, 0]

    assert logits.shape == (BATCH, 1)
    assert jnp.allclose(logits, ref, atol=1e-3, rtol=1e-3), float(jnp.max(jnp.abs(logits - ref)))

    print("KERNEL_OK")
</pallas_src>

<mosaic_0001>
module attributes {stable_mosaic.version = 11 : i64} {
  func.func @mlp_kernel(%arg0: i32, %arg1: memref<128x32xbf16, #tpu.memory_space<vmem>>, %arg2: memref<32x32xbf16, #tpu.memory_space<vmem>>, %arg3: memref<1x32xf32, #tpu.memory_space<vmem>>, %arg4: memref<1x32xf32, #tpu.memory_space<vmem>>, %arg5: memref<1x1xf32, #tpu.memory_space<smem>>, %arg6: memref<128x1xf32, #tpu.memory_space<vmem>>) attributes {dimension_semantics = [#tpu.dimension_semantics<parallel>], iteration_bounds = array<i64: 2>, scalar_prefetch = 0 : i64, scratch_operands = 0 : i64, tpu.core_type = #tpu.core_type<tc>, window_params = [{transform_indices = @transform_0, window_bounds = array<i64: 128, 32>}, {pipeline_mode = #tpu.pipeline_mode<synchronous>, transform_indices = @transform_1, window_bounds = array<i64: 32, 32>}, {pipeline_mode = #tpu.pipeline_mode<synchronous>, transform_indices = @transform_2, window_bounds = array<i64: 1, 32>}, {pipeline_mode = #tpu.pipeline_mode<synchronous>, transform_indices = @transform_3, window_bounds = array<i64: 1, 32>}, {transform_indices = @transform_4, window_bounds = array<i64: 1, 1>}, {transform_indices = @transform_5, window_bounds = array<i64: 128, 1>}]} {
    %c0 = arith.constant 0 : index
    %c0_0 = arith.constant 0 : index
    %0 = vector.load %arg1[%c0, %c0_0] : memref<128x32xbf16, #tpu.memory_space<vmem>>, vector<128x32xbf16>
    %c0_1 = arith.constant 0 : index
    %c0_2 = arith.constant 0 : index
    %1 = vector.load %arg2[%c0_1, %c0_2] : memref<32x32xbf16, #tpu.memory_space<vmem>>, vector<32x32xbf16>
    %cst = arith.constant dense<0.000000e+00> : vector<128x32xf32>
    %2 = tpu.matmul %0, %1, %cst {dimension_numbers = #tpu.dot_dimension_numbers<[1], [0], [0], [1], [0, 0, 1, 1], [], []>} : vector<128x32xbf16>, vector<32x32xbf16>, vector<128x32xf32> -> vector<128x32xf32>
    %c0_3 = arith.constant 0 : index
    %c0_4 = arith.constant 0 : index
    %3 = vector.load %arg3[%c0_3, %c0_4] : memref<1x32xf32, #tpu.memory_space<vmem>>, vector<1x32xf32>
    %4 = vector.broadcast %3 : vector<1x32xf32> to vector<128x32xf32>
    %5 = arith.addf %2, %4 : vector<128x32xf32>
    %6 = math.tanh %5 : vector<128x32xf32>
    %c0_5 = arith.constant 0 : index
    %c0_6 = arith.constant 0 : index
    %7 = vector.load %arg4[%c0_5, %c0_6] : memref<1x32xf32, #tpu.memory_space<vmem>>, vector<1x32xf32>
    %8 = vector.broadcast %7 : vector<1x32xf32> to vector<128x32xf32>
    %9 = arith.mulf %6, %8 : vector<128x32xf32>
    %cst_7 = arith.constant dense<0.000000e+00> : vector<128xf32>
    %10 = vector.multi_reduction <add>, %9, %cst_7 [1] : vector<128x32xf32> to vector<128xf32>
    %11 = vector.shape_cast %10 : vector<128xf32> to vector<128x1xf32>
    %c0_8 = arith.constant 0 : index
    %c0_9 = arith.constant 0 : index
    %12 = memref.load %arg5[%c0_8, %c0_9] : memref<1x1xf32, #tpu.memory_space<smem>>
    %13 = vector.broadcast %12 : f32 to vector<128x1xf32>
    %14 = arith.addf %11, %13 : vector<128x1xf32>
    %c0_10 = arith.constant 0 : index
    %c0_11 = arith.constant 0 : index
    %15 = vector.load %arg6[%c0_10, %c0_11] : memref<128x1xf32, #tpu.memory_space<vmem>>, vector<128x1xf32>
    tpu.vector_store %arg6[%c0_10, %c0_11], %14 {strides = array<i32>} : memref<128x1xf32, #tpu.memory_space<vmem>>, vector<128x1xf32>,
    return
  }
  func.func @transform_0(%arg0: i32) -> (i32, i32) {
    %c0_i32 = arith.constant 0 : i32
    %c0_i32_0 = arith.constant 0 : i32
    return %arg0, %c0_i32 : i32, i32
  }
  func.func @transform_1(%arg0: i32) -> (i32, i32) {
    %c0_i32 = arith.constant 0 : i32
    %c0_i32_0 = arith.constant 0 : i32
    %c0_i32_1 = arith.constant 0 : i32
    return %c0_i32, %c0_i32_0 : i32, i32
  }
  func.func @transform_2(%arg0: i32) -> (i32, i32) {
    %c0_i32 = arith.constant 0 : i32
    %c0_i32_0 = arith.constant 0 : i32
    %c0_i32_1 = arith.constant 0 : i32
    return %c0_i32, %c0_i32_0 : i32, i32
  }
  func.func @transform_3(%arg0: i32) -> (i32, i32) {
    %c0_i32 = arith.constant 0 : i32
    %c0_i32_0 = arith.constant 0 : i32
    %c0_i32_1 = arith.constant 0 : i32
    return %c0_i32, %c0_i32_0 : i32, i32
  }
  func.func @transform_4(%arg0: i32) -> (i32, i32) {
    %c0_i32 = arith.constant 0 : i32
    %c0_i32_0 = arith.constant 0 : i32
    %c0_i32_1 = arith.constant 0 : i32
    return %c0_i32, %c0_i32_0 : i32, i32
  }
  func.func @transform_5(%arg0: i32) -> (i32, i32) {
    %c0_i32 = arith.constant 0 : i32
    %c0_i32_0 = arith.constant 0 : i32
    return %arg0, %c0_i32 : i32, i32
  }
}

</mosaic_0001>

<bundles_post_ra>
// kernel: tpu_custom_call.1
= control target key start
LH: loop header
LB: loop body
LE: loop exit
PB: predicated region body
PF: predicated region fallthrough
CT: control target
= control target key end

     0   :  { %s765_s20 = smov 0   ;;  %s892_s0 = inlined_call_operand.vmem [shape: bf16[256,32], index: 0, kind: input, shape index: {}]   ;;  %s893_s1 = inlined_call_operand.vmem [shape: bf16[32,32], index: 1, kind: input, shape index: {}]   ;;  %s894_s2 = inlined_call_operand.vmem [shape: f32[1,32], index: 2, kind: input, shape index: {}]   ;;  %s895_s3 = inlined_call_operand.vmem [shape: f32[1,32], index: 3, kind: input, shape index: {}]   ;;  %s896_s4 = inlined_call_operand.<no memory space> [shape: f32[1,1], index: 4, kind: input, shape index: {}]   ;;  %s897_s5 = inlined_call_operand.vmem [shape: f32[256,1], index: 5, kind: output, shape index: {}]  }
   0x1   :  { %10 = sst [smem:[#allocation2]] %s896_s4 }
   0x2 LB: > { %s609_s21 = sadd.s32 4294967295, %s730_s20   ;;  %p613_p0 = scmp.ge.s32.totalorder %s730_s20, 1  ;;  %s730_s20 = sphi %s765_s20, %s16_s20  }
   0x3   : > { %p189_p1 = scmp.lt.s32.totalorder %s730_s20, 3 }
   0x5   : > { %p190_p2 = pnand %p613_p0, %p189_p1 }
   0x6   : > { %v682_v0 = vld [vmem:[%s893_s1] sm:$0xff] (!%p190_p2)   ;;  %s614_s4 = sshll.u32 (!%p190_p2), %s609_s21, 4  ;;  %v683_v1 = vld [vmem:[%s893_s1 + $0x8] sm:$0xff] (!%p190_p2)   ;;  %vm309_vm0 = vcmask (!%p190_p2), 261120   ;;  %s518_s9 = sld [smem:[#allocation2]] (!%p190_p2)  ;;  %vm536_vm1 = vcmask (!%p190_p2), 7168  }
   0x7   : > { %193 = sbr.rel (%p190_p2) target bundleno = 421 (0x1a5), region = 40  ;;  %p218_p3 = scmp.lt.s32.totalorder (!%p190_p2), %s614_s4, 31  ;;  %650 = vmatprep.subr.bf16.mxu0 (!%p190_p2), %v682_v0  ;;  %670 = vmatprep.subr.bf16.mxu1 (!%p190_p2), %v682_v0  ;;  %v796_v10 = vld [vmem:[%s894_s2] ss:$0 sm:$0xff] (!%p190_p2) }
   0x8   : > { %651 = vmatpush3.bf16.msra.mxu0 (!%p190_p2), %v682_v0  ;;  %672 = vmatpush3.bf16.msra.mxu1 (!%p190_p2), %v682_v0  ;;  %v810_v34 = vld [vmem:[%s895_s3] ss:$0 sm:$0xff] (!%p190_p2) }
   0x9   : > { %652 = vmatprep.subr.bf16.mxu0 (!%p190_p2), %v683_v1  ;;  %671 = vmatprep.subr.bf16.mxu1 (!%p190_p2), %v683_v1 }
   0xc   : > { %653 = vmatpush3.bf16.msra.mxu0 (!%p190_p2), %v683_v1  ;;  %673 = vmatpush3.bf16.msra.mxu1 (!%p190_p2), %v683_v1 }
   0xe   : > { %s899_s4 = smov (!%p218_p3, %s614_s4), 31 }
   0xf   : > { %s615_s26 = sshll.u32 %s899_s4, 2  ;;  %s617_s10 = sshll.u32 %s899_s4, 3 }
  0x10   : > { %s221_s29 = scalar_lea.vmem %s892_s0, %s615_s26  ;;  %s855_s13 = scalar_lea.vmem %s897_s5, %s617_s10 }
  0x11   : > { %v684_v2 = vld [vmem:[%s221_s29] sm:$0xff]   ;;  %v686_v4 = vld [vmem:[%s221_s29 + $0x8] sm:$0xff]   ;;  %v688_v6 = vld [vmem:[%s221_s29 + $0x10] sm:$0xff]  }
  0x12   : > { %v685_v3 = vld [vmem:[%s221_s29 + $0x20] sm:$0xff]   ;;  %654 = vmatprep.mubr.msk.bf16.mxu0 %vm309_vm0, %v684_v2  ;;  %v687_v5 = vld [vmem:[%s221_s29 + $0x28] sm:$0xff]   ;;  %v690_v7 = vld [vmem:[%s221_s29 + $0x30] sm:$0xff]  }
  0x13   : > { %662 = vmatprep.mubr.msk.bf16.mxu1 %vm309_vm0, %v685_v3  ;;  %655 = vmatmul.mubr.msk.bf16.vlgmr.msra.gmra.mrb[0].mxu0 %vm309_vm0, %v686_v4  ;;  %v689_v8 = vld [vmem:[%s221_s29 + $0x18] sm:$0xff]  }
  0x14   : > { %663 = vmatmul.mubr.msk.bf16.vlgmr.msra.gmra.mrb[0].mxu1 %vm309_vm0, %v687_v5  ;;  %658 = vmatprep.mubr.msk.bf16.mxu0 %vm309_vm0, %v688_v6  ;;  %v691_v9 = vld [vmem:[%s221_s29 + $0x38] sm:$0xff]  }
  0x15   : > { %666 = vmatprep.mubr.msk.bf16.mxu1 %vm309_vm0, %v690_v7 }
  0x1b   : > { %659 = vmatmul.mubr.msk.bf16.gmra.mrb[4].mxu0 %vm309_vm0, %v689_v8 }
  0x1c   : > { %667 = vmatmul.mubr.msk.bf16.gmra.mrb[4].mxu1 %vm309_vm0, %v691_v9 }
  0xe6   : > { %v656_v11 = vpop.f32.mrb[0].mxu0 }
  0xe7   : > { %v377_v12 = vadd.f32 %v656_v11, %v796_v10  ;;  %v664_v13 = vpop.f32.mrb[0].mxu1  ;;  %v368_v14 = vpop.f32.mrb[1].mxu0 }
  0xe8   : > { %v409_v15 = vadd.f32 %v664_v13, %v796_v10  ;;  %v369_v16 = vadd.f32 %v796_v10, %v368_v14  ;;  %v400_v17 = vpop.f32.mrb[1].mxu1  ;;  %v657_v18 = vpop.f32.mrb[2].mxu0 }
  0xe9   : > { %692 = vtanh.f32 %v377_v12  ;;  %v401_v19 = vadd.f32 %v796_v10, %v400_v17  ;;  %v380_v20 = vadd.f32 %v657_v18, %v796_v10  ;;  %v665_v21 = vpop.f32.mrb[2].mxu1  ;;  %v371_v22 = vpop.f32.mrb[3].mxu0 }
  0xea   : > { %694 = vtanh.f32 %v409_v15  ;;  %v412_v23 = vadd.f32 %v665_v21, %v796_v10  ;;  %v403_v24 = vpop.f32.mrb[3].mxu1  ;;  %v372_v26 = vadd.f32 %v796_v10, %v371_v22 }
  0xeb   : > { %696 = vtanh.f32 %v369_v16  ;;  %v404_v25 = vadd.f32 %v796_v10, %v403_v24 }
  0xec   : > { %698 = vtanh.f32 %v401_v19 }
  0xed   : > { %700 = vtanh.f32 %v380_v20 }
  0xee   : > { %702 = vtanh.f32 %v412_v23  ;;  %v660_v27 = vpop.f32.mrb[4].mxu0 }
  0xef   : > { %v384_v28 = vpop.f32.mrb[5].mxu0  ;;  %v668_v29 = vpop.f32.mrb[4].mxu1  ;;  %704 = vtanh.f32 %v404_v25  ;;  %v393_v36 = vadd.f32 %v660_v27, %v796_v10 }
  0xf0   : > { %v661_v30 = vpop.f32.mrb[6].mxu0  ;;  %v416_v31 = vpop.f32.mrb[5].mxu1  ;;  %706 = vtanh.f32 %v372_v26  ;;  %v385_v45 = vadd.f32 %v796_v10, %v384_v28  ;;  %v425_v61 = vadd.f32 %v668_v29, %v796_v10  ;;  %v519_v28 = vstv %s518_s9 }
  0xf1   : > { %v396_v32 = vadd.f32 %v661_v30, %v796_v10  ;;  %v387_v33 = vpop.f32.mrb[7].mxu0  ;;  %v669_v35 = vpop.f32.mrb[6].mxu1  ;;  %v417_v53 = vadd.f32 %v796_v10, %v416_v31 }
  0xf2   : > { %v419_v37 = vpop.f32.mrb[7].mxu1  ;;  %v388_v42 = vadd.f32 %v796_v10, %v387_v33  ;;  %v428_v60 = vadd.f32 %v669_v35, %v796_v10 }
  0xf3   : > { %v693_v38 = vpop.eup %692  ;;  %708 = vtanh.f32 %v396_v32  ;;  %v420_v52 = vadd.f32 %v796_v10, %v419_v37 }
  0xf4   : > { %v695_v39 = vpop.eup %694  ;;  %v456_v40 = vmul.f32 %v693_v38, %v810_v34  ;;  %710 = vtanh.f32 %v393_v36 }
  0xf5   : > { %v697_v41 = vpop.eup %696  ;;  %v464_v43 = vmul.f32 %v695_v39, %v810_v34  ;;  %712 = vtanh.f32 %v388_v42 }
  0xf6   : > { %v699_v44 = vpop.eup %698  ;;  %v476_v46 = vsel %vm309_vm0, %v456_v40, 0.0  ;;  %v454_v49 = vmul.f32 %v697_v41, %v810_v34  ;;  %714 = vtanh.f32 %v385_v45 }
  0xf7   : > { %v701_v47 = vpop.eup %700  ;;  %v500_v48 = vsel %vm309_vm0, %v464_v43, 0.0  ;;  %477 = vadd.xlane.f32.xlu1 %v476_v46  ;;  %v462_v58 = vmul.f32 %v699_v44, %v810_v34  ;;  %716 = vtanh.f32 %v420_v52 }
  0xf8   : > { %v703_v50 = vpop.eup %702  ;;  %501 = vadd.xlane.f32.xlu0 %v500_v48  ;;  %v457_v51 = vmul.f32 %v701_v47, %v810_v34  ;;  %v470_v57 = vsel %vm309_vm0, %v454_v49, 0.0  ;;  %718 = vtanh.f32 %v417_v53 }
  0xf9   : > { %v465_v55 = vmul.f32 %v703_v50, %v810_v34  ;;  %v705_v56 = vpop.eup %704  ;;  %v494_v1 = vsel %vm309_vm0, %v462_v58, 0.0  ;;  %720 = vtanh.f32 %v428_v60 }
  0xfa   : > { %v479_v54 = vsel %vm309_vm0, %v457_v51, 0.0  ;;  %v707_v59 = vpop.eup %706  ;;  %v463_v63 = vmul.f32 %v705_v56, %v810_v34  ;;  %722 = vtanh.f32 %v425_v61 }
  0xfb   : > { %480 = vadd.xlane.f32.xlu1 %v479_v54  ;;  %v503_v62 = vsel %vm309_vm0, %v465_v55, 0.0  ;;  %v455_v2 = vmul.f32 %v707_v59, %v810_v34 }
  0xfc   : > { %471 = vadd.xlane.f32.xlu0 %v470_v57  ;;  %v497_v4 = vsel %vm309_vm0, %v463_v63, 0.0 }
  0xfd   : > { %v709_v0 = vpop.eup %708  ;;  %v473_v7 = vsel %vm309_vm0, %v455_v2, 0.0 }
  0xfe   : > { %v711_v3 = vpop.eup %710  ;;  %v461_v5 = vmul.f32 %v709_v0, %v810_v34 }
  0xff   : > { %504 = vadd.xlane.f32.xlu1 %v503_v62  ;;  %v713_v6 = vpop.eup %712  ;;  %v460_v8 = vmul.f32 %v711_v3, %v810_v34 }
 0x100   : > { %495 = vadd.xlane.f32.xlu0 %v494_v1  ;;  %v715_v9 = vpop.eup %714  ;;  %v491_v10 = vsel %vm309_vm0, %v461_v5, 0.0  ;;  %v459_v11 = vmul.f32 %v713_v6, %v810_v34 }
 0x101   : > { %v717_v12 = vpop.eup %716  ;;  %v488_v13 = vsel %vm309_vm0, %v460_v8, 0.0  ;;  %v458_v14 = vmul.f32 %v715_v9, %v810_v34 }
 0x102   : > { %v719_v15 = vpop.eup %718  ;;  %v485_v16 = vsel %vm309_vm0, %v459_v11, 0.0  ;;  %v467_v17 = vmul.f32 %v717_v12, %v810_v34 }
 0x103   : > { %498 = vadd.xlane.f32.xlu1 %v497_v4  ;;  %v721_v18 = vpop.eup %720  ;;  %v482_v19 = vsel %vm309_vm0, %v458_v14, 0.0  ;;  %v466_v20 = vmul.f32 %v719_v15, %v810_v34 }
 0x104   : > { %474 = vadd.xlane.f32.xlu0 %v473_v7  ;;  %v723_v21 = vpop.eup %722  ;;  %v509_v22 = vsel %vm309_vm0, %v467_v17, 0.0  ;;  %v469_v23 = vmul.f32 %v721_v18, %v810_v34 }
 0x105   : > { %v506_v24 = vsel %vm309_vm0, %v466_v20, 0.0  ;;  %v468_v25 = vmul.f32 %v723_v21, %v810_v34 }
 0x106   : > { %v515_v26 = vsel %vm309_vm0, %v469_v23, 0.0 }
 0x107   : > { %492 = vadd.xlane.f32.xlu1 %v491_v10  ;;  %v512_v27 = vsel %vm309_vm0, %v468_v25, 0.0 }
 0x108   : > { %489 = vadd.xlane.f32.xlu0 %v488_v13 }
 0x10b   : > { %486 = vadd.xlane.f32.xlu1 %v485_v16 }
 0x10c   : > { %483 = vadd.xlane.f32.xlu0 %v482_v19 }
 0x10f   : > { %510 = vadd.xlane.f32.xlu1 %v509_v22 }
 0x110   : > { %507 = vadd.xlane.f32.xlu0 %v506_v24 }
 0x113   : > { %516 = vadd.xlane.f32.xlu1 %v515_v26 }
 0x114   : > { %513 = vadd.xlane.f32.xlu0 %v512_v27 }
 0x184   : > { %v478_v29 = vpop.xlane.xlu1 %477 }
 0x185   : > { %v502_v30 = vpop.xlane.xlu0 %501  ;;  %v522_v31 = vadd.f32 %v519_v28, %v478_v29 }
 0x186   : > { %v530_v32 = vadd.f32 %v519_v28, %v502_v30 }
 0x187   : > { %539 = vst.msk [vmem:[%s855_s13 + $0x10] sm:$0xff] %vm536_vm1, %v522_v31 }
 0x188   : > { %547 = vst.msk [vmem:[%s855_s13 + $0x50] sm:$0xff] %vm536_vm1, %v530_v32  ;;  %v481_v33 = vpop.xlane.xlu1 %480 }
 0x189   : > { %v523_v34 = vadd.f32 %v519_v28, %v481_v33  ;;  %v472_v35 = vpop.xlane.xlu0 %471 }
 0x18a   : > { %v520_v36 = vadd.f32 %v519_v28, %v472_v35 }
 0x18b   : > { %540 = vst.msk [vmem:[%s855_s13 + $0x18] sm:$0xff] %vm536_vm1, %v523_v34 }
 0x18c   : > { %537 = vst.msk [vmem:[%s855_s13] sm:$0xff] %vm536_vm1, %v520_v36  ;;  %v505_v37 = vpop.xlane.xlu1 %504 }
 0x18d   : > { %v531_v38 = vadd.f32 %v519_v28, %v505_v37  ;;  %v496_v39 = vpop.xlane.xlu0 %495 }
 0x18e   : > { %v528_v40 = vadd.f32 %v519_v28, %v496_v39 }
 0x18f   : > { %548 = vst.msk [vmem:[%s855_s13 + $0x58] sm:$0xff] %vm536_vm1, %v531_v38 }
 0x190   : > { %545 = vst.msk [vmem:[%s855_s13 + $0x40] sm:$0xff] %vm536_vm1, %v528_v40  ;;  %v499_v41 = vpop.xlane.xlu1 %498 }
 0x191   : > { %v529_v42 = vadd.f32 %v519_v28, %v499_v41  ;;  %v475_v43 = vpop.xlane.xlu0 %474 }
 0x192   : > { %v521_v44 = vadd.f32 %v519_v28, %v475_v43 }
 0x193   : > { %546 = vst.msk [vmem:[%s855_s13 + $0x48] sm:$0xff] %vm536_vm1, %v529_v42 }
 0x194   : > { %538 = vst.msk [vmem:[%s855_s13 + $0x8] sm:$0xff] %vm536_vm1, %v521_v44  ;;  %v493_v45 = vpop.xlane.xlu1 %492 }
 0x195   : > { %v527_v46 = vadd.f32 %v519_v28, %v493_v45  ;;  %v490_v47 = vpop.xlane.xlu0 %489 }
 0x196   : > { %v526_v48 = vadd.f32 %v519_v28, %v490_v47 }
 0x197   : > { %544 = vst.msk [vmem:[%s855_s13 + $0x38] sm:$0xff] %vm536_vm1, %v527_v46 }
 0x198   : > { %543 = vst.msk [vmem:[%s855_s13 + $0x30] sm:$0xff] %vm536_vm1, %v526_v48  ;;  %v487_v49 = vpop.xlane.xlu1 %486 }
 0x199   : > { %v525_v50 = vadd.f32 %v519_v28, %v487_v49  ;;  %v484_v51 = vpop.xlane.xlu0 %483 }
 0x19a   : > { %v524_v52 = vadd.f32 %v519_v28, %v484_v51 }
 0x19b   : > { %542 = vst.msk [vmem:[%s855_s13 + $0x28] sm:$0xff] %vm536_vm1, %v525_v50 }
 0x19c   : > { %541 = vst.msk [vmem:[%s855_s13 + $0x20] sm:$0xff] %vm536_vm1, %v524_v52  ;;  %v511_v53 = vpop.xlane.xlu1 %510 }
 0x19d   : > { %v533_v54 = vadd.f32 %v519_v28, %v511_v53  ;;  %v508_v55 = vpop.xlane.xlu0 %507 }
 0x19e   : > { %v532_v56 = vadd.f32 %v519_v28, %v508_v55 }
 0x19f   : > { %550 = vst.msk [vmem:[%s855_s13 + $0x68] sm:$0xff] %vm536_vm1, %v533_v54 }
 0x1a0   : > { %549 = vst.msk [vmem:[%s855_s13 + $0x60] sm:$0xff] %vm536_vm1, %v532_v56  ;;  %v517_v57 = vpop.xlane.xlu1 %516 }
 0x1a1   : > { %v535_v58 = vadd.f32 %v519_v28, %v517_v57  ;;  %v514_v59 = vpop.xlane.xlu0 %513 }
 0x1a2   : > { %v534_v60 = vadd.f32 %v519_v28, %v514_v59 }
 0x1a3   : > { %552 = vst.msk [vmem:[%s855_s13 + $0x78] sm:$0xff] %vm536_vm1, %v535_v58 }
 0x1a4   : > { %551 = vst.msk [vmem:[%s855_s13 + $0x70] sm:$0xff] %vm536_vm1, %v534_v60 }
 0x1a5 PF: > { %s16_s20 = sadd.s32 1, %s730_s20  }
 0x1a6   : > { %p13_p4 = scmp.ge.s32.totalorder %s16_s20, 4  }
 0x1a8   :  { %15 = sbr.rel (!%p13_p4) target bundleno = 2 (0x2), region = 70 }

</bundles_post_ra>
